<compile_context>
chip_gen: v6e
topology: v6e:2x2x1
jax: 0.10.0
libtpu: 0.0.40
codegen_flags: <defaults>
</compile_context>

<pallas_src>
import functools

import numpy as np
import jax
import jax.numpy as jnp
from jax import lax
from jax.experimental import pallas as pl
from jax.experimental.pallas import tpu as pltpu

CURV_K = 1.0  # CustomLorentz default curvature


def _round_up(x, m):
    return ((x + m - 1) // m) * m


# --------------------------------------------------------------------------------------
# Fused kernel: token-row HBM gather (shared-sem DMAs) + position one-hot gather (MXU)
#               + space add + add_time, one full-width lane-dense store.
# --------------------------------------------------------------------------------------
def _embed_kernel(tok_ids_ref,            # SMEM scalar prefetch: flat token ids [N_pad]
                  pos_ids_ref,            # VMEM: position ids for this tile [TN, 1] int32
                  tok_hbm,                # HBM (pl.ANY): token table [V, D1P]
                  pos_vmem,               # VMEM (resident): position table [P, D1P]
                  o_ref,                  # VMEM output tile [TN, D1P]
                  tok_buf,                # VMEM scratch [TN, D1P]
                  copy_sem,               # single shared DMA semaphore
                  *, tn, num_pos, inv_k):
    base = pl.program_id(0) * tn

    # 1) Issue all token-row gathers for this tile; every copy signals the SAME semaphore.
    @pl.loop(0, tn)
    def _start(r):
        tid = tok_ids_ref[base + r]
        pltpu.make_async_copy(tok_hbm.at[pl.ds(tid, 1)],
                              tok_buf.at[pl.ds(r, 1)],
                              copy_sem).start()

    # 2) Position-row gather via one-hot matmul on the VMEM-resident table.
    #    Independent of the token DMAs -> overlaps with them.
    pids = pos_ids_ref[...]                                              # (TN, 1) int32
    cols = lax.broadcasted_iota(jnp.int32, (tn, num_pos), 1)             # (TN, P)
    onehot = (pids == cols).astype(jnp.float32)
    pos_rows = jnp.dot(onehot, pos_vmem[...].astype(jnp.float32),
                       preferred_element_type=jnp.float32)               # (TN, D1P)

    # 3) One aggregate wait consumes all TN row-copy completions (byte-count semantics:
    #    sum of the TN (1, D1P) copies == size of the full buffer).
    pltpu.make_async_copy(tok_buf, tok_buf, copy_sem).wait()

    # 4) Epilogue: drop the Lorentz time column, add space components, re-derive time.
    s = tok_buf[...].astype(jnp.float32) + pos_rows                      # col 0 = garbage (t+t)
    lane = lax.broadcasted_iota(jnp.int32, s.shape, 1)
    space = jnp.where(lane == 0, 0.0, s)                                 # zero out time column
    time = jnp.sqrt(jnp.sum(space * space, axis=-1, keepdims=True) + inv_k)
    o_ref[...] = jnp.where(lane == 0, time, space).astype(o_ref.dtype)   # single full-width store


def hyp_clip_text_embeddings_forward(input_ids, token_table, position_table,
                                     position_ids=None, *, curv_k=CURV_K, tile_rows=256):
    """input_ids: [B, T] int; tables: [V, D+1], [P, D+1] Lorentz points. Returns [B, T, D+1]."""
    b, t = input_ids.shape
    d1 = token_table.shape[-1]
    num_pos = position_table.shape[0]
    if position_ids is None:
        position_ids = jnp.arange(t, dtype=jnp.int32)[None, :]
    pos_ids = jnp.broadcast_to(position_ids, (b, t)).astype(jnp.int32)

    n = b * t
    tn = min(tile_rows, _round_up(n, 8))          # rows per grid step (multiple of 8)
    n_pad = _round_up(n, tn)

    # Lane-dense rows: pad the Lorentz dim up to a multiple of 128 so every row DMA and the
    # output store are unmasked and >= 512 B contiguous.  Padded columns are zero, contribute
    # nothing to the norm, and are sliced off at the end.
    d1p = max(128, _round_up(d1, 128))
    # TODO(synk): in production, keep the embedding tables stored pre-padded to avoid this
    #             per-call pad of the full vocab table.
    tok_tbl = jnp.pad(token_table, ((0, 0), (0, d1p - d1)))
    pos_tbl = jnp.pad(position_table, ((0, 0), (0, d1p - d1)))

    tok_flat = jnp.pad(input_ids.reshape(-1).astype(jnp.int32), (0, n_pad - n))
    pos_flat = jnp.pad(pos_ids.reshape(-1), (0, n_pad - n)).reshape(n_pad, 1)

    grid_spec = pltpu.PrefetchScalarGridSpec(
        num_scalar_prefetch=1,                    # flat token ids -> SMEM (drive the DMA gather)
        grid=(n_pad // tn,),
        in_specs=[
            pl.BlockSpec((tn, 1), lambda i, *_: (i, 0)),           # position ids (VMEM tile)
            pl.BlockSpec(memory_space=pl.ANY),                     # token table stays in HBM
            pl.BlockSpec((num_pos, d1p), lambda i, *_: (0, 0)),    # position table: VMEM resident
        ],
        out_specs=pl.BlockSpec((tn, d1p), lambda i, *_: (i, 0)),
        scratch_shapes=[
            pltpu.VMEM((tn, d1p), token_table.dtype),              # token gather buffer
            pltpu.SemaphoreType.DMA,                               # one shared DMA semaphore
        ],
    )

    out = pl.pallas_call(
        functools.partial(_embed_kernel, tn=tn, num_pos=num_pos, inv_k=1.0 / curv_k),
        grid_spec=grid_spec,
        out_shape=jax.ShapeDtypeStruct((n_pad, d1p), token_table.dtype),
        compiler_params=pltpu.CompilerParams(dimension_semantics=("parallel",)),
    )(tok_flat, pos_flat, tok_tbl, pos_tbl)

    return out[:n, :d1].reshape(b, t, d1)


# --------------------------------------------------------------------------------------
# Deterministic LorentzEmbedding-style table init: rows are valid Lorentz points.
# --------------------------------------------------------------------------------------
def make_lorentz_table(key, rows, hidden_size, curv_k=CURV_K, init_std=0.02):
    space = init_std * jax.random.normal(key, (rows, hidden_size), jnp.float32)
    time = jnp.sqrt(jnp.sum(space * space, axis=-1, keepdims=True) + 1.0 / curv_k)
    return jnp.concatenate([time, space], axis=-1)


# --------------------------------------------------------------------------------------
# Pure-JAX reference (correctness check only).
# --------------------------------------------------------------------------------------
def ref_forward(input_ids, token_table, position_table, position_ids=None, curv_k=CURV_K):
    b, t = input_ids.shape
    if position_ids is None:
        position_ids = jnp.arange(t, dtype=jnp.int32)[None, :]
    tok = token_table[input_ids]                   # [B, T, D+1]
    pos = position_table[position_ids]             # [1, T, D+1] (broadcasts over batch)
    space = tok[..., 1:] + pos[..., 1:]
    time = jnp.sqrt(jnp.sum(space * space, axis=-1, keepdims=True) + 1.0 / curv_k)
    return jnp.concatenate([time, space], axis=-1)


if __name__ == "__main__":
    hidden_size = 32          # config.hidden_size  -> Lorentz dim = 33
    vocab_size = 64           # config.vocab_size (small demo)
    max_positions = 16        # config.max_position_embeddings
    batch, seq = 2, 8

    key = jax.random.PRNGKey(0)
    k_tok, k_pos, k_ids = jax.random.split(key, 3)
    token_table = make_lorentz_table(k_tok, vocab_size, hidden_size)
    position_table = make_lorentz_table(k_pos, max_positions, hidden_size)
    input_ids = jax.random.randint(k_ids, (batch, seq), 0, vocab_size, dtype=jnp.int32)

    out = hyp_clip_text_embeddings_forward(input_ids, token_table, position_table)
    out = jax.block_until_ready(out)

    ref = jax.block_until_ready(ref_forward(input_ids, token_table, position_table))
    np.testing.assert_allclose(np.asarray(out), np.asarray(ref), rtol=1e-5, atol=1e-5)
    print("KERNEL_OK")
</pallas_src>

<mosaic_0001>
module attributes {stable_mosaic.version = 11 : i64} {
  func.func @_embed_kernel(%arg0: i32, %arg1: memref<16xi32, #tpu.memory_space<smem>>, %arg2: memref<16x1xi32, #tpu.memory_space<vmem>>, %arg3: memref<64x128xf32, #tpu.memory_space<any>>, %arg4: memref<16x128xf32, #tpu.memory_space<vmem>>, %arg5: memref<16x128xf32, #tpu.memory_space<vmem>>, %arg6: memref<16x128xf32, #tpu.memory_space<vmem>>, %arg7: memref<!tpu.dma_semaphore, #tpu.memory_space<semaphore_mem>>) attributes {dimension_semantics = [#tpu.dimension_semantics<parallel>], iteration_bounds = array<i64: 1>, scalar_prefetch = 1 : i64, scratch_operands = 2 : i64, tpu.core_type = #tpu.core_type<tc>, window_params = [{transform_indices = @transform_0, window_bounds = array<i64: 16, 1>}, {}, {pipeline_mode = #tpu.pipeline_mode<synchronous>, transform_indices = @transform_2, window_bounds = array<i64: 16, 128>}, {transform_indices = @transform_3, window_bounds = array<i64: 16, 128>}]} {
    %c16_i32 = arith.constant 16 : i32
    %0 = arith.muli %arg0, %c16_i32 : i32
    %c0_i32 = arith.constant 0 : i32
    %c16_i32_0 = arith.constant 16 : i32
    %1 = arith.addi %c0_i32, %c16_i32_0 : i32
    %c1_i32 = arith.constant 1 : i32
    scf.for %arg8 = %c0_i32 to %1 step %c1_i32  : i32 {
      %c1_i32_14 = arith.constant 1 : i32
      %29 = arith.muli %arg8, %c1_i32_14 : i32
      %c0_i32_15 = arith.constant 0 : i32
      %30 = arith.addi %c0_i32_15, %29 : i32
      %31 = arith.addi %0, %30 : i32
      %32 = arith.index_cast %31 : i32 to index
      %33 = memref.load %arg1[%32] : memref<16xi32, #tpu.memory_space<smem>>
      %c0_i32_16 = arith.constant 0 : i32
      %34 = tpu.memref_slice %arg3[%33, %c0_i32_16] : memref<64x128xf32, #tpu.memory_space<any>> -> memref<1x128xf32, #tpu.memory_space<any>>
      %c0_i32_17 = arith.constant 0 : i32
      %35 = tpu.memref_slice %arg6[%30, %c0_i32_17] : memref<16x128xf32, #tpu.memory_space<vmem>> -> memref<1x128xf32, #tpu.memory_space<vmem>>
      tpu.enqueue_dma source(%34 : memref<1x128xf32, #tpu.memory_space<any>>) target(%35 : memref<1x128xf32, #tpu.memory_space<vmem>>) target_semaphore(%arg7 : memref<!tpu.dma_semaphore, #tpu.memory_space<semaphore_mem>>)
    }
    %c16_i32_1 = arith.constant 16 : i32
    %c0 = arith.constant 0 : index
    %c0_2 = arith.constant 0 : index
    %2 = vector.load %arg2[%c0, %c0_2] : memref<16x1xi32, #tpu.memory_space<vmem>>, vector<16x1xi32>
    %3 = tpu.iota {dimensions = array<i32: 1>} : vector<16x16xi32>
    %4 = vector.broadcast %2 : vector<16x1xi32> to vector<16x16xi32>
    %5 = arith.cmpi eq, %4, %3 : vector<16x16xi32>
    %6 = arith.extui %5 : vector<16x16xi1> to vector<16x16xi32>
    %7 = arith.sitofp %6 : vector<16x16xi32> to vector<16x16xf32>
    %c0_3 = arith.constant 0 : index
    %c0_4 = arith.constant 0 : index
    %8 = vector.load %arg4[%c0_3, %c0_4] : memref<16x128xf32, #tpu.memory_space<vmem>>, vector<16x128xf32>
    %cst = arith.constant dense<0.000000e+00> : vector<16x128xf32>
    %9 = tpu.matmul %7, %8, %cst {dimension_numbers = #tpu.dot_dimension_numbers<[1], [0], [0], [1], [0, 0, 1, 1], [], []>} : vector<16x16xf32>, vector<16x128xf32>, vector<16x128xf32> -> vector<16x128xf32>
    tpu.wait_dma2 semaphore(%arg7 : memref<!tpu.dma_semaphore, #tpu.memory_space<semaphore_mem>>) src(%arg6 : memref<16x128xf32, #tpu.memory_space<vmem>>) dst(%arg6 : memref<16x128xf32, #tpu.memory_space<vmem>>)
    %c0_5 = arith.constant 0 : index
    %c0_6 = arith.constant 0 : index
    %10 = vector.load %arg6[%c0_5, %c0_6] : memref<16x128xf32, #tpu.memory_space<vmem>>, vector<16x128xf32>
    %11 = arith.addf %10, %9 : vector<16x128xf32>
    %12 = tpu.iota {dimensions = array<i32: 1>} : vector<16x128xi32>
    %c0_i32_7 = arith.constant 0 : i32
    %13 = vector.broadcast %c0_i32_7 : i32 to vector<16x128xi32>
    %14 = arith.cmpi eq, %12, %13 : vector<16x128xi32>
    %cst_8 = arith.constant 0.000000e+00 : f32
    %15 = vector.broadcast %cst_8 : f32 to vector<16x128xf32>
    %16 = arith.select %14, %15, %11 : vector<16x128xi1>, vector<16x128xf32>
    %17 = arith.mulf %16, %16 : vector<16x128xf32>
    %cst_9 = arith.constant dense<0.000000e+00> : vector<16xf32>
    %18 = vector.multi_reduction <add>, %17, %cst_9 [1] : vector<16x128xf32> to vector<16xf32>
    %19 = vector.shape_cast %18 : vector<16xf32> to vector<16x1xf32>
    %cst_10 = arith.constant 1.000000e+00 : f32
    %20 = vector.broadcast %cst_10 : f32 to vector<16x1xf32>
    %21 = arith.addf %19, %20 : vector<16x1xf32>
    %22 = math.sqrt %21 : vector<16x1xf32>
    %c0_i32_11 = arith.constant 0 : i32
    %23 = vector.broadcast %c0_i32_11 : i32 to vector<16x128xi32>
    %24 = arith.cmpi eq, %12, %23 : vector<16x128xi32>
    %25 = vector.shape_cast %22 : vector<16x1xf32> to vector<16x1xf32>
    %26 = vector.broadcast %25 : vector<16x1xf32> to vector<16x128xf32>
    %27 = arith.select %24, %26, %16 : vector<16x128xi1>, vector<16x128xf32>
    %c0_12 = arith.constant 0 : index
    %c0_13 = arith.constant 0 : index
    %28 = vector.load %arg5[%c0_12, %c0_13] : memref<16x128xf32, #tpu.memory_space<vmem>>, vector<16x128xf32>
    tpu.vector_store %arg5[%c0_12, %c0_13], %27 {strides = array<i32>} : memref<16x128xf32, #tpu.memory_space<vmem>>, vector<16x128xf32>,
    return
  }
  func.func @transform_0(%arg0: i32, %arg1: memref<16xi32, #tpu.memory_space<smem>>) -> (i32, i32) {
    %c0_i32 = arith.constant 0 : i32
    %c0_i32_0 = arith.constant 0 : i32
    return %arg0, %c0_i32 : i32, i32
  }
  func.func @transform_2(%arg0: i32, %arg1: memref<16xi32, #tpu.memory_space<smem>>) -> (i32, i32) {
    %c0_i32 = arith.constant 0 : i32
    %c0_i32_0 = arith.constant 0 : i32
    %c0_i32_1 = arith.constant 0 : i32
    return %c0_i32, %c0_i32_0 : i32, i32
  }
  func.func @transform_3(%arg0: i32, %arg1: memref<16xi32, #tpu.memory_space<smem>>) -> (i32, i32) {
    %c0_i32 = arith.constant 0 : i32
    %c0_i32_0 = arith.constant 0 : i32
    return %arg0, %c0_i32 : i32, i32
  }
}

</mosaic_0001>

<bundles_post_ra>
// kernel: tpu_custom_call.1
= control target key start
LH: loop header
LB: loop body
LE: loop exit
PB: predicated region body
PF: predicated region fallthrough
CT: control target
= control target key end

     0   :  { %s386_s0 = inlined_call_operand.vmem [shape: s32[16], index: 0, kind: input, shape index: {}]   ;;  %s387_s1 = inlined_call_operand.vmem [shape: s32[16,1], index: 1, kind: input, shape index: {}]   ;;  %s388_s2 = inlined_call_operand.hbm [shape: f32[64,128], index: 2, kind: input, shape index: {}]   ;;  %s389_s3 = inlined_call_operand.vmem [shape: f32[16,128], index: 3, kind: input, shape index: {}]   ;;  %s390_s4 = inlined_call_operand.hbm [shape: f32[16,128], index: 4, kind: output, shape index: {}]  }
   0x1   :  { %s9_s17 = sshll.u32 %s386_s0, 4  ;;  %s10_s17 = int_to_ptr.vmem [resolvable:$true] %s9_s17 }
   0x2   :  { %s245_s18 = scalar_lea.vmem %s10_s17, 16  ;;  %p250_p1 = scmp.lt.s32.totalorder %s10_s17, %s10_s17 }
   0x3   :  { %p246_p0 = scmp.ne.s32.totalorder %s10_s17, %s245_s18  ;;  %p251_p2 = scmp.lt.s32.totalorder %s245_s18, %s245_s18 }
   0x5   :  { %p252_p3 = por %p251_p2, %p250_p1 }
   0x7   :  { %p253_p4 = pnand %p252_p3, %p246_p0 }
   0x9   :  { %256 = shalt.err (!%p253_p4)  }
   0xa   :  { %s313_s19 = smov [#allocation5]  }
   0xb   :  { %12 = dma.vmem_to_smem %s10_s17, 16, %s313_s19, [#allocation4] }
   0xc   :  { %303 = dma.done.wait [#allocation4], 16 }
   0xd   :  { %304 = vsyncadd [#allocation4], 4294967280 }
   0xe   :  { %14 = sfence }
   0xf   :  { %15 = vsyncpa [#allocation7], 0  ;;  %s348_s20 = smov 0  }
  0x10 LB: > { %s28_s0 = sld [smem:[#allocation5 + %s311_s20]]  ;;  %s31_s21 = scalar_lea.vmem [#allocation2], %s311_s20  ;;  %s311_s20 = sphi %s348_s20, %s26_s20  }
  0x11   : > { %s39_s22 = sshll.u32 %s31_s21, 4  ;;  %s259_s30 = scalar_lea.hbm %s388_s2, 1024  ;;  %s40_s22 = int_to_ptr.vmem [resolvable:$true] %s39_s22 }
  0x16   : > { %s209_s23 = sshll.u32 %s28_s0, 4 }
  0x17   : > { %s30_s26 = scalar_lea.hbm %s388_s2, %s209_s23 }
  0x18   : > { %s257_s27 = scalar_lea.hbm %s30_s26, 16  ;;  %p260_p6 = scmp.lt.s32.totalorder %s30_s26, %s388_s2 }
  0x19   : > { %p258_p5 = scmp.ne.s32.totalorder %s30_s26, %s257_s27  ;;  %p261_p7 = scmp.lt.s32.totalorder %s259_s30, %s257_s27 }
  0x1b   : > { %p262_p8 = por %p261_p7, %p260_p6 }
  0x1d   : > { %p263_p9 = pnand %p262_p8, %p258_p5 }
  0x1f   : > { %266 = shalt.err (!%p263_p9)  }
  0x20   : > { %s267_s7 = scalar_lea.vmem %s40_s22, 16  ;;  %s314_s8 = smov [#allocation2]  }
  0x21   : > { %p268_p10 = scmp.ne.s32.totalorder %s40_s22, %s267_s7  ;;  %s269_s9 = sshll.u32 %s314_s8, 4  ;;  %s270_s9 = int_to_ptr.vmem [resolvable:$false] %s269_s9 }
  0x22   : > { %s271_s10 = scalar_lea.vmem %s270_s9, 256  ;;  %p272_p11 = scmp.lt.s32.totalorder %s40_s22, %s270_s9 }
  0x23   : > { %p273_p12 = scmp.lt.s32.totalorder %s271_s10, %s267_s7 }
  0x25   : > { %p274_p13 = por %p273_p12, %p272_p11 }
  0x27   : > { %p275_p0 = pnand %p274_p13, %p268_p10 }
  0x29   : > { %278 = shalt.err (!%p275_p0)  }
  0x2a   : > { %42 = dma.hbm_to_vmem [thread:$0]  %s30_s26, 16, %s40_s22, [#allocation3] }
  0x2b   : > { %s26_s20 = sadd.s32 1, %s311_s20  }
  0x2c   : > { %p23_p1 = scmp.ge.s32.totalorder %s26_s20, 16  }
  0x2d   :  { %v43_v0 = vld [vmem:[%s387_s1] sm:$0xff] (%p23_p1)  ;;  %v60_v1 = vld [vmem:[%s389_s3 + $0x8] sm:$0xff] (%p23_p1)  ;;  %v315_v2 = vmov (%p23_p1), 0   ;;  %v45_v5 = vlaneseq (%p23_p1)  ;;  %vm61_vm0 = vcmask (%p23_p1), 130048   ;;  %v316_v8 = vmov (%p23_p1), 0.0  }
  0x2e   :  { %25 = sbr.rel (!%p23_p1) target bundleno = 16 (0x10), region = 41  ;;  %240 = vset.pattern.permute.xlu0 (%p23_p1), %v315_v2  ;;  %219 = vmatprep.subr.mxu0 (%p23_p1), %v60_v1  ;;  %v59_v3 = vld [vmem:[%s389_s3] sm:$0xff] (%p23_p1)  ;;  %v44_v4 = vld [vmem:[%s387_s1 + $0x8] sm:$0xff] (%p23_p1) }
  0x2f   :  { %48 = vperm.xlu0 (%p23_p1), %240, %v43_v0   ;;  %220 = vmatpush3.msra.mxu0 (%p23_p1), %v60_v1  ;;  %v46_v6 = vand.u32 (%p23_p1), 127, %v45_v5 }
  0x30   :  { %221 = vmatprep.subr.mxu0 (%p23_p1), %v59_v3 }
  0x31   :  { %222 = vmatpush3.msra.mxu0 (%p23_p1), %v59_v3 }
  0x33   :  { %51 = vperm.xlu0 %240, %v44_v4  }
  0xaa   :  { %v49_v7 = vpop.permute.xlu0 %48 }
  0xab   :  { %vm53_vm1 = vcmp.eq.s32.totalorder %v49_v7, %v46_v6 }
  0xac   :  { %v210_v9 = vsel %vm53_vm1, 1.0, %v316_v8 }
  0xad   :  { %223 = vmatprep.mubr.msk.f32.mxu0 %vm61_vm0, %v210_v9 }
  0xae   :  { %v52_v10 = vpop.permute.xlu0 %51 }
  0xaf   :  { %vm54_vm2 = vcmp.eq.s32.totalorder %v52_v10, %v46_v6 }
  0xb0   :  { %v211_v11 = vsel %vm54_vm2, 1.0, %v316_v8 }
  0xb1   :  { %224 = vmatmul.mubr.msk.f32.vlgmr.msra.gmra.mxu0 %vm61_vm0, %v211_v11 }
 0x171   :  { %v225_v12 = vpop.f32.mrf.mxu0 }
 0x173   :  { %v134_v13 = vpop.f32.mrf.mxu0 }
 0x174   :  { %305 = dma.done.wait [#allocation3], 256 }
 0x175   :  { %306 = vsyncadd [#allocation3], 4294967040  ;;  %v146_v14 = vld [vmem:[#allocation2] sm:$0xff]  ;;  %vm150_vm3 = vcmp.eq.s32.totalorder %v46_v6, 0  ;;  %v147_v15 = vld [vmem:[#allocation2 + $0x8] sm:$0xff]  ;;  %s317_s1 = smov [#allocation6]  }
 0x176   :  { %v148_v16 = vadd.f32 %v146_v14, %v134_v13  ;;  %v149_v17 = vadd.f32 %v225_v12, %v147_v15  ;;  %s184_s2 = sshll.u32 %s317_s1, 4  ;;  %s185_s2 = int_to_ptr.vmem [resolvable:$true] %s184_s2 }
 0x177   :  { %s279_s3 = scalar_lea.vmem %s185_s2, 256  ;;  %p284_p3 = scmp.lt.s32.totalorder %s185_s2, %s185_s2 }
 0x178   :  { %v151_v18 = vsel %vm150_vm3, 0.0, %v148_v16  ;;  %v152_v19 = vsel %vm150_vm3, 0.0, %v149_v17  ;;  %p280_p2 = scmp.ne.s32.totalorder %s185_s2, %s279_s3  ;;  %p285_p4 = scmp.lt.s32.totalorder %s279_s3, %s279_s3 }
 0x179   :  { %v153_v20 = vmul.f32 %v151_v18, %v151_v18  ;;  %v154_v21 = vmul.f32 %v152_v19, %v152_v19 }
 0x17a   :  { %p286_p5 = por %p285_p4, %p284_p3 }
 0x17b   :  { %155 = vadd.xlane.f32.xlu0 %v153_v20 }
 0x17c   :  { %p287_p6 = pnand %p286_p5, %p280_p2 }
 0x17f   :  { %157 = vadd.xlane.f32.xlu0 %v154_v21 }
 0x204   :  { %v156_v22 = vpop.xlane.xlu0 %155 }
 0x205   :  { %v159_v23 = vadd.f32 1.0, %v156_v22 }
 0x207   :  { %241 = vrsqrt.f32 %v159_v23  ;;  %vm163_vm4 = vcmp.eq.f32.partialorder %v159_v23, inf  ;;  %v166_v28 = vand.u32 2147483648, %v159_v23  ;;  %vm165_vm5 = vcmp.eq.f32.partialorder %v159_v23, 0.0 }
 0x208   :  { %v158_v24 = vpop.xlane.xlu0 %157 }
 0x209   :  { %v160_v25 = vadd.f32 1.0, %v158_v24 }
 0x20b   :  { %243 = vrsqrt.f32 %v160_v25  ;;  %vm170_vm6 = vcmp.eq.f32.partialorder %v160_v25, inf  ;;  %v173_v34 = vand.u32 2147483648, %v160_v25  ;;  %vm172_vm7 = vcmp.eq.f32.partialorder %v160_v25, 0.0 }
 0x214   :  { %v242_v26 = vpop.eup %241 }
 0x215   :  { %v162_v27 = vmul.f32 %v242_v26, %v159_v23 }
 0x217   :  { %v164_v29 = vsel %vm163_vm4, %v159_v23, %v162_v27 }
 0x218   :  { %v244_v30 = vpop.eup %243  ;;  %v167_v31 = vsel %vm165_vm5, %v166_v28, %v164_v29 }
 0x219   :  { %v169_v32 = vmul.f32 %v244_v30, %v160_v25  ;;  %v175_v33 = vsel %vm150_vm3, %v167_v31, %v148_v16 }
 0x21a   :  { %177 = vst [vmem:[#allocation6] sm:$0xff] %v175_v33 }
 0x21b   :  { %v171_v35 = vsel %vm170_vm6, %v160_v25, %v169_v32 }
 0x21c   :  { %v174_v36 = vsel %vm172_vm7, %v173_v34, %v171_v35 }
 0x21d   :  { %v176_v37 = vsel %vm150_vm3, %v174_v36, %v149_v17 }
 0x21e   :  { %178 = vst [vmem:[#allocation6 + $0x8] sm:$0xff] %v176_v37 }
 0x21f   :  { %290 = shalt.err (!%p287_p6)
}
 0x220   :  { %s318_s19 = smov 128   ;;  %s319_s20 = smov 8  }
 0x221   :  { %190 = dma.vmem_to_hbm [thread:$0]  %s185_s2, 256, %s390_s4, [#allocation7], %s318_s19, %s318_s19, %s319_s20  }
 0x222   :  { %307 = dma.done.wait [#allocation7], 256  }
 0x223   :  { %308 = vsyncadd [#allocation7], 4294967040 }
 0x224   :  { %194 = vsyncpa [#allocation7], 1 }
 0x225   :  { %195 = vsyncmov [#allocation3] }
 0x228   :  { %s196_s22 = vpop.sfrf %195 }
 0x229   :  { %p214_p7 = scmp.ne.s32.totalorder %s196_s22, 0 }
 0x22b   :  { %200 = shalt.err (%p214_p7)  }

</bundles_post_ra>
